<compile_context>
chip_gen: v7x
topology: tpu7x:2x2x1
jax: 0.10.0
libtpu: 0.0.40
codegen_flags: <defaults>
</compile_context>

<pallas_src>
import jax
import jax.numpy as jnp
from jax.experimental import pallas as pl
from jax.experimental.pallas import tpu as pltpu

H1 = 128           # lstm1 hidden size (per direction)
H2 = 64            # lstm2 hidden size (per direction)
BN_EPS = 1e-5
MAX_BLOCK_B = 512  # batch rows per grid step (per-step f32 intermediates ~3.5 MB << VMEM)


def lstm_model_kernel(
    x_ref,
    w1_ref, b1_ref,        # lstm1: fused fwd+bwd, gates [i|g|o] packed, f-gate dropped
    w2_ref, b2_ref,        # lstm2: fused fwd+bwd, gates [i|g|o] packed, bn1 folded in
    wfc1_ref, bfc1_ref,    # fc1 with bn2 folded in
    wfc2_ref, bfc2_ref,    # fc2 row vector + bias
    out_ref,
):
    x = x_ref[...]

    # ---- lstm1 (bidirectional, T == 1, h0 = c0 = 0) ----
    # Packed gate columns: [i_f|i_b | g_f|g_b | o_f|o_b]; each block is 2*H1 = 256 lanes wide,
    # so every slice below is 128-lane aligned (no relayout).
    g1 = jnp.dot(x.astype(jnp.bfloat16), w1_ref[...],
                 preferred_element_type=jnp.float32) + b1_ref[...]
    i1 = jax.nn.sigmoid(g1[:, 0 * 2 * H1:1 * 2 * H1])
    c1 = i1 * jnp.tanh(g1[:, 1 * 2 * H1:2 * 2 * H1])                  # f-gate dead: c = i * g
    h1 = jax.nn.sigmoid(g1[:, 2 * 2 * H1:3 * 2 * H1]) * jnp.tanh(c1)  # (B, 256) == [h_f | h_b]
    # bn1 + dropout1: bn folded into w2/b2, dropout identity in eval.

    # ---- lstm2 (bidirectional, T == 1) ----
    g2 = jnp.dot(h1.astype(jnp.bfloat16), w2_ref[...],
                 preferred_element_type=jnp.float32) + b2_ref[...]
    i2 = jax.nn.sigmoid(g2[:, 0 * 2 * H2:1 * 2 * H2])
    c2 = i2 * jnp.tanh(g2[:, 1 * 2 * H2:2 * 2 * H2])
    h2 = jax.nn.sigmoid(g2[:, 2 * 2 * H2:3 * 2 * H2]) * jnp.tanh(c2)  # (B, 128) == [h_f | h_b]
    # bn2 + dropout2: bn folded into wfc1/bfc1, dropout identity in eval.

    # ---- fc1 -> ReLU ----
    fc1 = jnp.dot(h2.astype(jnp.bfloat16), wfc1_ref[...],
                  preferred_element_type=jnp.float32) + bfc1_ref[...]
    relu = jnp.maximum(fc1, 0.0)
    # dropout3: identity in eval.

    # ---- fc2 (64 -> 1): VPU broadcast-multiply + XLU lane reduction (avoid N=1 MXU matmul) ----
    out = jnp.sum(relu * wfc2_ref[...], axis=-1, keepdims=True) + bfc2_ref[...]
    out_ref[...] = out.astype(out_ref.dtype)


def init_params(key, input_features):
    """Deterministic parameter init mirroring PyTorch shapes/defaults (gate order [i,f,g,o])."""
    ks = jax.random.split(key, 16)

    def unif(k, shape, bound):
        return jax.random.uniform(k, shape, jnp.float32, -bound, bound)

    p = {}
    b1 = 1.0 / jnp.sqrt(jnp.float32(H1))
    p["w1f"] = unif(ks[0], (4 * H1, input_features), b1)
    p["b1f"] = unif(ks[1], (1, 4 * H1), b1) + unif(ks[2], (1, 4 * H1), b1)   # b_ih + b_hh
    p["w1b"] = unif(ks[3], (4 * H1, input_features), b1)
    p["b1b"] = unif(ks[4], (1, 4 * H1), b1) + unif(ks[5], (1, 4 * H1), b1)
    # bn1 (PyTorch defaults: gamma=1, beta=0, running_mean=0, running_var=1)
    p["g1"] = jnp.ones((1, 2 * H1), jnp.float32)
    p["be1"] = jnp.zeros((1, 2 * H1), jnp.float32)
    p["m1"] = jnp.zeros((1, 2 * H1), jnp.float32)
    p["v1"] = jnp.ones((1, 2 * H1), jnp.float32)
    # lstm2
    b2 = 1.0 / jnp.sqrt(jnp.float32(H2))
    p["w2f"] = unif(ks[6], (4 * H2, 2 * H1), b2)
    p["b2f"] = unif(ks[7], (1, 4 * H2), b2) + unif(ks[8], (1, 4 * H2), b2)
    p["w2b"] = unif(ks[9], (4 * H2, 2 * H1), b2)
    p["b2b"] = unif(ks[10], (1, 4 * H2), b2) + unif(ks[11], (1, 4 * H2), b2)
    # bn2
    p["g2"] = jnp.ones((1, 2 * H2), jnp.float32)
    p["be2"] = jnp.zeros((1, 2 * H2), jnp.float32)
    p["m2"] = jnp.zeros((1, 2 * H2), jnp.float32)
    p["v2"] = jnp.ones((1, 2 * H2), jnp.float32)
    # fc1 / fc2
    bf1 = 1.0 / jnp.sqrt(jnp.float32(2 * H2))
    p["wfc1"] = unif(ks[12], (H2, 2 * H2), bf1)
    p["bfc1"] = unif(ks[13], (1, H2), bf1)
    bf2 = 1.0 / jnp.sqrt(jnp.float32(H2))
    p["wfc2"] = unif(ks[14], (1, H2), bf2)
    p["bfc2"] = unif(ks[15], (1, 1), bf2)
    return p


def prepare_params(p, weights_dtype=jnp.bfloat16):
    """One-time packing: fuse LSTM directions, drop dead f-gate, fold BNs, transpose, cast.

    Exact eval-mode semantics up to bf16 rounding of the large weight matrices.
    """
    def pack_lstm(wf, bf, wb, bb, hidden):
        # PyTorch gate order along 4*hidden is [i, f, g, o]; with c0 == 0 and T == 1 the
        # f-gate never contributes, so it is dropped.
        wfT, wbT = wf.T, wb.T                          # (in, 4*hidden)
        cols_w, cols_b = [], []
        for g_idx in (0, 2, 3):                        # keep i, g, o; gate-major across dirs
            sl = slice(g_idx * hidden, (g_idx + 1) * hidden)
            cols_w += [wfT[:, sl], wbT[:, sl]]
            cols_b += [bf[:, sl], bb[:, sl]]
        return jnp.concatenate(cols_w, axis=1), jnp.concatenate(cols_b, axis=1)

    w1, b1 = pack_lstm(p["w1f"], p["b1f"], p["w1b"], p["b1b"], H1)    # (F, 768), (1, 768)
    w2, b2 = pack_lstm(p["w2f"], p["b2f"], p["w2b"], p["b2b"], H2)    # (256, 384), (1, 384)

    # Fold bn1 (eval affine: y = x*s1 + t1) into lstm2's input matmul.
    s1 = p["g1"] * jax.lax.rsqrt(p["v1"] + BN_EPS)      # (1, 256)
    t1 = p["be1"] - p["m1"] * s1
    b2 = b2 + t1 @ w2                                   # uses the *unscaled* w2
    w2 = w2 * s1.reshape(-1, 1)

    # Fold bn2 into fc1.
    wfc1 = p["wfc1"].T                                  # (128, 64)
    s2 = p["g2"] * jax.lax.rsqrt(p["v2"] + BN_EPS)      # (1, 128)
    t2 = p["be2"] - p["m2"] * s2
    bfc1 = p["bfc1"] + t2 @ wfc1
    wfc1 = wfc1 * s2.reshape(-1, 1)

    return {
        "w1": w1.astype(weights_dtype), "b1": b1.astype(jnp.float32),
        "w2": w2.astype(weights_dtype), "b2": b2.astype(jnp.float32),
        "wfc1": wfc1.astype(weights_dtype), "bfc1": bfc1.astype(jnp.float32),
        "wfc2": p["wfc2"].astype(jnp.float32), "bfc2": p["bfc2"].astype(jnp.float32),
    }


@jax.jit
def lstm_model_forward(x, packed):
    """x: (B, 1, F) float32, packed = prepare_params(...) -> (B, 1) float32."""
    B, T, F = x.shape
    assert T == 1, "forward() squeezes the time axis; T must be 1"
    x2d = x.reshape(B, F)

    # Pad batch to a sublane multiple and tile it; batch tiles shard across TensorCores.
    bp = ((B + 7) // 8) * 8
    block_b = min(bp, MAX_BLOCK_B)
    bp = ((bp + block_b - 1) // block_b) * block_b
    if bp != B:
        x2d = jnp.pad(x2d, ((0, bp - B), (0, 0)))

    weight_args = (packed["w1"], packed["b1"], packed["w2"], packed["b2"],
                   packed["wfc1"], packed["bfc1"], packed["wfc2"], packed["bfc2"])

    def rep_spec(a):
        # Full-array block, constant block index -> fetched once, VMEM-resident across steps.
        return pl.BlockSpec(a.shape, lambda i: (0, 0))

    flops = 2 * bp * (F * 6 * H1 + 2 * H1 * 6 * H2 + 2 * H2 * H2 + H2)
    transcendentals = bp * (8 * H1 + 8 * H2)
    bytes_accessed = int(sum(a.size * a.dtype.itemsize for a in weight_args)
                         + x2d.size * 4 + bp * 4)

    out = pl.pallas_call(
        lstm_model_kernel,
        out_shape=jax.ShapeDtypeStruct((bp, 1), jnp.float32),
        grid=(bp // block_b,),
        in_specs=[pl.BlockSpec((block_b, F), lambda i: (i, 0))]
                 + [rep_spec(a) for a in weight_args],
        out_specs=pl.BlockSpec((block_b, 1), lambda i: (i, 0)),
        compiler_params=pltpu.CompilerParams(
            dimension_semantics=("parallel",)),
        cost_estimate=pl.CostEstimate(
            flops=flops, transcendentals=transcendentals,
            bytes_accessed=bytes_accessed),
    )(x2d, *weight_args)
    return out[:B]


def reference_forward(x, p):
    """Pure-JAX f32 reference of the same eval-mode PyTorch forward pass."""
    B, T, F = x.shape
    xi = x.reshape(B, F)

    def step(xin, w, b, hidden):
        gates = xin @ w.T + b[0]
        i = jax.nn.sigmoid(gates[:, :hidden])
        g = jnp.tanh(gates[:, 2 * hidden:3 * hidden])
        o = jax.nn.sigmoid(gates[:, 3 * hidden:])
        return o * jnp.tanh(i * g)      # c0 == 0 -> f-gate contribution vanishes

    out1 = jnp.concatenate([step(xi, p["w1f"], p["b1f"], H1),
                            step(xi, p["w1b"], p["b1b"], H1)], axis=1)
    bn1 = (out1 - p["m1"][0]) / jnp.sqrt(p["v1"][0] + BN_EPS) * p["g1"][0] + p["be1"][0]
    out2 = jnp.concatenate([step(bn1, p["w2f"], p["b2f"], H2),
                            step(bn1, p["w2b"], p["b2b"], H2)], axis=1)
    bn2 = (out2 - p["m2"][0]) / jnp.sqrt(p["v2"][0] + BN_EPS) * p["g2"][0] + p["be2"][0]
    fc1 = jnp.maximum(bn2 @ p["wfc1"].T + p["bfc1"][0], 0.0)
    return fc1 @ p["wfc2"].T + p["bfc2"][0]


if __name__ == "__main__":
    key = jax.random.PRNGKey(0)
    kx, kp = jax.random.split(key)

    batch = 8
    input_features = 24     # NASA turbofan sensor/feature count (small synthetic choice)
    seq = 1                 # forward() squeezes dim 1, so T must be 1

    x = jax.random.normal(kx, (batch, seq, input_features), jnp.float32)
    params = init_params(kp, input_features)

    # One-time weight packing (kept out of the inference path).
    packed = jax.block_until_ready(prepare_params(params))

    out = lstm_model_forward(x, packed)
    out = jax.block_until_ready(out)

    ref = reference_forward(x, params)
    assert out.shape == (batch, 1), out.shape
    # Tolerance covers bf16 rounding of the packed weight matrices (activations/accum stay f32).
    assert jnp.allclose(out, ref, atol=3e-2, rtol=3e-2), (out, ref)

    print("KERNEL_OK")
</pallas_src>

<mosaic_0001>
module attributes {stable_mosaic.version = 11 : i64} {
  func.func @lstm_model_kernel(%arg0: i32, %arg1: memref<8x24xf32, #tpu.memory_space<vmem>>, %arg2: memref<24x768xbf16, #tpu.memory_space<vmem>>, %arg3: memref<1x768xf32, #tpu.memory_space<vmem>>, %arg4: memref<256x384xbf16, #tpu.memory_space<vmem>>, %arg5: memref<1x384xf32, #tpu.memory_space<vmem>>, %arg6: memref<128x64xbf16, #tpu.memory_space<vmem>>, %arg7: memref<1x64xf32, #tpu.memory_space<vmem>>, %arg8: memref<1x64xf32, #tpu.memory_space<vmem>>, %arg9: memref<1x1xf32, #tpu.memory_space<vmem>>, %arg10: memref<8x1xf32, #tpu.memory_space<vmem>>) attributes {dimension_semantics = [#tpu.dimension_semantics<parallel>], iteration_bounds = array<i64: 1>, scalar_prefetch = 0 : i64, scratch_operands = 0 : i64, tpu.core_type = #tpu.core_type<tc>, window_params = [{transform_indices = @transform_0, window_bounds = array<i64: 8, 24>}, {pipeline_mode = #tpu.pipeline_mode<synchronous>, transform_indices = @transform_1, window_bounds = array<i64: 24, 768>}, {pipeline_mode = #tpu.pipeline_mode<synchronous>, transform_indices = @transform_2, window_bounds = array<i64: 1, 768>}, {pipeline_mode = #tpu.pipeline_mode<synchronous>, transform_indices = @transform_3, window_bounds = array<i64: 256, 384>}, {pipeline_mode = #tpu.pipeline_mode<synchronous>, transform_indices = @transform_4, window_bounds = array<i64: 1, 384>}, {pipeline_mode = #tpu.pipeline_mode<synchronous>, transform_indices = @transform_5, window_bounds = array<i64: 128, 64>}, {pipeline_mode = #tpu.pipeline_mode<synchronous>, transform_indices = @transform_6, window_bounds = array<i64: 1, 64>}, {pipeline_mode = #tpu.pipeline_mode<synchronous>, transform_indices = @transform_7, window_bounds = array<i64: 1, 64>}, {pipeline_mode = #tpu.pipeline_mode<synchronous>, transform_indices = @transform_8, window_bounds = array<i64: 1, 1>}, {transform_indices = @transform_9, window_bounds = array<i64: 8, 1>}]} {
    %c0 = arith.constant 0 : index
    %c0_0 = arith.constant 0 : index
    %0 = vector.load %arg1[%c0, %c0_0] : memref<8x24xf32, #tpu.memory_space<vmem>>, vector<8x24xf32>
    %1 = arith.truncf %0 : vector<8x24xf32> to vector<8x24xbf16>
    %c0_1 = arith.constant 0 : index
    %c0_2 = arith.constant 0 : index
    %2 = vector.load %arg2[%c0_1, %c0_2] : memref<24x768xbf16, #tpu.memory_space<vmem>>, vector<24x768xbf16>
    %cst = arith.constant dense<0.000000e+00> : vector<8x768xf32>
    %3 = tpu.matmul %1, %2, %cst {dimension_numbers = #tpu.dot_dimension_numbers<[1], [0], [0], [1], [0, 0, 1, 1], [], []>} : vector<8x24xbf16>, vector<24x768xbf16>, vector<8x768xf32> -> vector<8x768xf32>
    %c0_3 = arith.constant 0 : index
    %c0_4 = arith.constant 0 : index
    %4 = vector.load %arg3[%c0_3, %c0_4] : memref<1x768xf32, #tpu.memory_space<vmem>>, vector<1x768xf32>
    %5 = vector.broadcast %4 : vector<1x768xf32> to vector<8x768xf32>
    %6 = arith.addf %3, %5 : vector<8x768xf32>
    %7 = vector.extract_strided_slice %6 {offsets = [0, 0], sizes = [8, 256], strides = [1, 1]} : vector<8x768xf32> to vector<8x256xf32>
    %8 = arith.negf %7 : vector<8x256xf32>
    %9 = math.exp %8 : vector<8x256xf32>
    %cst_5 = arith.constant 1.000000e+00 : f32
    %10 = vector.broadcast %cst_5 : f32 to vector<8x256xf32>
    %11 = arith.addf %10, %9 : vector<8x256xf32>
    %12 = arith.divf %10, %11 : vector<8x256xf32>
    %13 = vector.extract_strided_slice %6 {offsets = [0, 256], sizes = [8, 256], strides = [1, 1]} : vector<8x768xf32> to vector<8x256xf32>
    %14 = math.tanh %13 : vector<8x256xf32>
    %15 = arith.mulf %12, %14 : vector<8x256xf32>
    %16 = vector.extract_strided_slice %6 {offsets = [0, 512], sizes = [8, 256], strides = [1, 1]} : vector<8x768xf32> to vector<8x256xf32>
    %17 = arith.negf %16 : vector<8x256xf32>
    %18 = math.exp %17 : vector<8x256xf32>
    %cst_6 = arith.constant 1.000000e+00 : f32
    %19 = vector.broadcast %cst_6 : f32 to vector<8x256xf32>
    %20 = arith.addf %19, %18 : vector<8x256xf32>
    %21 = arith.divf %19, %20 : vector<8x256xf32>
    %22 = math.tanh %15 : vector<8x256xf32>
    %23 = arith.mulf %21, %22 : vector<8x256xf32>
    %24 = arith.truncf %23 : vector<8x256xf32> to vector<8x256xbf16>
    %c0_7 = arith.constant 0 : index
    %c0_8 = arith.constant 0 : index
    %25 = vector.load %arg4[%c0_7, %c0_8] : memref<256x384xbf16, #tpu.memory_space<vmem>>, vector<256x384xbf16>
    %cst_9 = arith.constant dense<0.000000e+00> : vector<8x384xf32>
    %26 = tpu.matmul %24, %25, %cst_9 {dimension_numbers = #tpu.dot_dimension_numbers<[1], [0], [0], [1], [0, 0, 1, 1], [], []>} : vector<8x256xbf16>, vector<256x384xbf16>, vector<8x384xf32> -> vector<8x384xf32>
    %c0_10 = arith.constant 0 : index
    %c0_11 = arith.constant 0 : index
    %27 = vector.load %arg5[%c0_10, %c0_11] : memref<1x384xf32, #tpu.memory_space<vmem>>, vector<1x384xf32>
    %28 = vector.broadcast %27 : vector<1x384xf32> to vector<8x384xf32>
    %29 = arith.addf %26, %28 : vector<8x384xf32>
    %30 = vector.extract_strided_slice %29 {offsets = [0, 0], sizes = [8, 128], strides = [1, 1]} : vector<8x384xf32> to vector<8x128xf32>
    %31 = arith.negf %30 : vector<8x128xf32>
    %32 = math.exp %31 : vector<8x128xf32>
    %cst_12 = arith.constant 1.000000e+00 : f32
    %33 = vector.broadcast %cst_12 : f32 to vector<8x128xf32>
    %34 = arith.addf %33, %32 : vector<8x128xf32>
    %35 = arith.divf %33, %34 : vector<8x128xf32>
    %36 = vector.extract_strided_slice %29 {offsets = [0, 128], sizes = [8, 128], strides = [1, 1]} : vector<8x384xf32> to vector<8x128xf32>
    %37 = math.tanh %36 : vector<8x128xf32>
    %38 = arith.mulf %35, %37 : vector<8x128xf32>
    %39 = vector.extract_strided_slice %29 {offsets = [0, 256], sizes = [8, 128], strides = [1, 1]} : vector<8x384xf32> to vector<8x128xf32>
    %40 = arith.negf %39 : vector<8x128xf32>
    %41 = math.exp %40 : vector<8x128xf32>
    %cst_13 = arith.constant 1.000000e+00 : f32
    %42 = vector.broadcast %cst_13 : f32 to vector<8x128xf32>
    %43 = arith.addf %42, %41 : vector<8x128xf32>
    %44 = arith.divf %42, %43 : vector<8x128xf32>
    %45 = math.tanh %38 : vector<8x128xf32>
    %46 = arith.mulf %44, %45 : vector<8x128xf32>
    %47 = arith.truncf %46 : vector<8x128xf32> to vector<8x128xbf16>
    %c0_14 = arith.constant 0 : index
    %c0_15 = arith.constant 0 : index
    %48 = vector.load %arg6[%c0_14, %c0_15] : memref<128x64xbf16, #tpu.memory_space<vmem>>, vector<128x64xbf16>
    %cst_16 = arith.constant dense<0.000000e+00> : vector<8x64xf32>
    %49 = tpu.matmul %47, %48, %cst_16 {dimension_numbers = #tpu.dot_dimension_numbers<[1], [0], [0], [1], [0, 0, 1, 1], [], []>} : vector<8x128xbf16>, vector<128x64xbf16>, vector<8x64xf32> -> vector<8x64xf32>
    %c0_17 = arith.constant 0 : index
    %c0_18 = arith.constant 0 : index
    %50 = vector.load %arg7[%c0_17, %c0_18] : memref<1x64xf32, #tpu.memory_space<vmem>>, vector<1x64xf32>
    %51 = vector.broadcast %50 : vector<1x64xf32> to vector<8x64xf32>
    %52 = arith.addf %49, %51 : vector<8x64xf32>
    %cst_19 = arith.constant 0.000000e+00 : f32
    %53 = vector.broadcast %cst_19 : f32 to vector<8x64xf32>
    %54 = arith.maximumf %52, %53 : vector<8x64xf32>
    %c0_20 = arith.constant 0 : index
    %c0_21 = arith.constant 0 : index
    %55 = vector.load %arg8[%c0_20, %c0_21] : memref<1x64xf32, #tpu.memory_space<vmem>>, vector<1x64xf32>
    %56 = vector.broadcast %55 : vector<1x64xf32> to vector<8x64xf32>
    %57 = arith.mulf %54, %56 : vector<8x64xf32>
    %cst_22 = arith.constant dense<0.000000e+00> : vector<8xf32>
    %58 = vector.multi_reduction <add>, %57, %cst_22 [1] : vector<8x64xf32> to vector<8xf32>
    %59 = vector.shape_cast %58 : vector<8xf32> to vector<8x1xf32>
    %c0_23 = arith.constant 0 : index
    %c0_24 = arith.constant 0 : index
    %60 = vector.load %arg9[%c0_23, %c0_24] : memref<1x1xf32, #tpu.memory_space<vmem>>, vector<1x1xf32>
    %61 = vector.broadcast %60 : vector<1x1xf32> to vector<8x1xf32>
    %62 = arith.addf %59, %61 : vector<8x1xf32>
    %c0_25 = arith.constant 0 : index
    %c0_26 = arith.constant 0 : index
    %63 = vector.load %arg10[%c0_25, %c0_26] : memref<8x1xf32, #tpu.memory_space<vmem>>, vector<8x1xf32>
    tpu.vector_store %arg10[%c0_25, %c0_26], %62 {strides = array<i32>} : memref<8x1xf32, #tpu.memory_space<vmem>>, vector<8x1xf32>,
    return
  }
  func.func @transform_0(%arg0: i32) -> (i32, i32) {
    %c0_i32 = arith.constant 0 : i32
    %c0_i32_0 = arith.constant 0 : i32
    return %arg0, %c0_i32 : i32, i32
  }
  func.func @transform_1(%arg0: i32) -> (i32, i32) {
    %c0_i32 = arith.constant 0 : i32
    %c0_i32_0 = arith.constant 0 : i32
    %c0_i32_1 = arith.constant 0 : i32
    return %c0_i32, %c0_i32_0 : i32, i32
  }
  func.func @transform_2(%arg0: i32) -> (i32, i32) {
    %c0_i32 = arith.constant 0 : i32
    %c0_i32_0 = arith.constant 0 : i32
    %c0_i32_1 = arith.constant 0 : i32
    return %c0_i32, %c0_i32_0 : i32, i32
  }
  func.func @transform_3(%arg0: i32) -> (i32, i32) {
    %c0_i32 = arith.constant 0 : i32
    %c0_i32_0 = arith.constant 0 : i32
    %c0_i32_1 = arith.constant 0 : i32
    return %c0_i32, %c0_i32_0 : i32, i32
  }
  func.func @transform_4(%arg0: i32) -> (i32, i32) {
    %c0_i32 = arith.constant 0 : i32
    %c0_i32_0 = arith.constant 0 : i32
    %c0_i32_1 = arith.constant 0 : i32
    return %c0_i32, %c0_i32_0 : i32, i32
  }
  func.func @transform_5(%arg0: i32) -> (i32, i32) {
    %c0_i32 = arith.constant 0 : i32
    %c0_i32_0 = arith.constant 0 : i32
    %c0_i32_1 = arith.constant 0 : i32
    return %c0_i32, %c0_i32_0 : i32, i32
  }
  func.func @transform_6(%arg0: i32) -> (i32, i32) {
    %c0_i32 = arith.constant 0 : i32
    %c0_i32_0 = arith.constant 0 : i32
    %c0_i32_1 = arith.constant 0 : i32
    return %c0_i32, %c0_i32_0 : i32, i32
  }
  func.func @transform_7(%arg0: i32) -> (i32, i32) {
    %c0_i32 = arith.constant 0 : i32
    %c0_i32_0 = arith.constant 0 : i32
    %c0_i32_1 = arith.constant 0 : i32
    return %c0_i32, %c0_i32_0 : i32, i32
  }
  func.func @transform_8(%arg0: i32) -> (i32, i32) {
    %c0_i32 = arith.constant 0 : i32
    %c0_i32_0 = arith.constant 0 : i32
    %c0_i32_1 = arith.constant 0 : i32
    return %c0_i32, %c0_i32_0 : i32, i32
  }
  func.func @transform_9(%arg0: i32) -> (i32, i32) {
    %c0_i32 = arith.constant 0 : i32
    %c0_i32_0 = arith.constant 0 : i32
    return %arg0, %c0_i32 : i32, i32
  }
}

</mosaic_0001>

<bundles_post_ra>
// kernel: lstm_model_forward.1
= control target key start
LH: loop header
LB: loop body
LE: loop exit
PB: predicated region body
PF: predicated region fallthrough
CT: control target
= control target key end

     0   :  { %s1347_s0 = inlined_call_operand.vmem [shape: f32[8,24], index: 0, kind: input, shape index: {}]   ;;  %s1348_s1 = inlined_call_operand.vmem [shape: bf16[24,768], index: 1, kind: input, shape index: {}]   ;;  %s1349_s2 = inlined_call_operand.vmem [shape: f32[1,768], index: 2, kind: input, shape index: {}]   ;;  %s1350_s3 = inlined_call_operand.hbm [shape: bf16[256,384], index: 3, kind: input, shape index: {}]   ;;  %s1351_s4 = inlined_call_operand.vmem [shape: f32[1,384], index: 4, kind: input, shape index: {}]   ;;  %s1352_s5 = inlined_call_operand.vmem [shape: bf16[128,64], index: 5, kind: input, shape index: {}]   ;;  %s1353_s6 = inlined_call_operand.vmem [shape: f32[1,64], index: 6, kind: input, shape index: {}]   ;;  %s1354_s7 = inlined_call_operand.vmem [shape: f32[1,64], index: 7, kind: input, shape index: {}]   ;;  %s1355_s8 = inlined_call_operand.<no memory space> [shape: f32[1,1], index: 8, kind: input, shape index: {}]   ;;  %s1356_s9 = inlined_call_operand.vmem [shape: f32[8,1], index: 9, kind: output, shape index: {}]  }
   0x1   :  { %v14_v0 = vstv %s1355_s8 }
   0x2   :  { %15 = vst [vmem:[#allocation2] sm:$0x1] %v14_v0 }
   0x3   :  { %16 = vsyncpa [#allocation4], 0  ;;  %s1178_s11 = smov [#allocation3]   ;;  %s1154_s15 = scalar_lea.hbm %s1350_s3, 6144 }
   0x4   :  { %s28_s12 = sshll.u32 %s1178_s11, 4  ;;  %p1155_p0 = scmp.ne.s32.totalorder %s1350_s3, %s1154_s15  ;;  %s29_s12 = int_to_ptr.vmem [resolvable:$true] %s28_s12 }
   0x5   :  { %p1158_p1 = scmp.lt.u32.totalorder %s1154_s15, %s1350_s3 }
   0x7   :  { %p1160_p2 = pnand %p1158_p1, %p1155_p0 }
   0x9   :  { %1163 = shalt.err (!%p1160_p2)
}
   0xa   :  { %s1164_s8 = scalar_lea.vmem %s29_s12, 6144  ;;  %p1169_p4 = scmp.lt.s32.totalorder %s29_s12, %s29_s12 }
   0xb   :  { %p1165_p3 = scmp.ne.s32.totalorder %s29_s12, %s1164_s8  ;;  %p1170_p5 = scmp.lt.s32.totalorder %s1164_s8, %s1164_s8 }
   0xd   :  { %p1171_p6 = por %p1170_p5, %p1169_p4 }
   0xf   :  { %p1172_p7 = pnand %p1171_p6, %p1165_p3 }
  0x11   :  { %1175 = shalt.err (!%p1172_p7)
}
  0x12   :  { %s1179_s20 = smov 192   ;;  %s1180_s21 = smov 12  }
  0x13   :  { %34 = dma.hbm_to_vmem [thread:$0]  %s1350_s3, 6144, %s29_s12, [#allocation4], %s1179_s20, %s1179_s20, %s1180_s21  }
  0x14   :  { %1176 = dma.done.wait [#allocation4], 6144  }
  0x15   :  { %1177 = vsyncadd [#allocation4], 4294961152  ;;  %v1181_v1 = vmov 0   ;;  %v1031_v2 = vld [vmem:[%s1348_s1 + $0x4] ss:$24 sps:$4 sm:$0xff]   ;;  %v57_v4 = vld [vmem:[%s1348_s1 + $0x30] sm:$0xff] }
  0x16   :  { %192 = vmatprep.mubr.bf16.mxu0 %v1181_v1  ;;  %233 = vmatprep.mubr.bf16.mxu1 %v1181_v1  ;;  %v1033_v3 = vld [vmem:[%s1348_s1] ss:$24 sps:$4 sm:$0xff]   ;;  %vm141_vm0 = vcmask 1043456   ;;  %v898_v5 = vcombine.high %v57_v4, %v57_v4  ;;  %v897_v6 = vcombine.low %v57_v4, %v57_v4  ;;  %v1038_v8 = vld [vmem:[%s1348_s1 + $0x14] ss:$24 sps:$4 sm:$0xff]   ;;  %vm137_vm1 = vcmask 195584  }
  0x17   :  { %160 = vmatprep.subr.bf16.mxu0 %v1031_v2  ;;  %v49_v7 = vld [vmem:[%s1347_s0] sm:$0xff]  ;;  %v58_v13 = vld [vmem:[%s1348_s1 + $0x38] sm:$0xff]  ;;  %v1036_v17 = vld [vmem:[%s1348_s1 + $0x10] ss:$24 sps:$4 sm:$0xff]   ;;  %vm1183_vm2 = vmmov 0   ;;  %vm872_vm3 = vcmask 523264  }
  0x18   :  { %161 = vmatpush1.bf16.msra.mxu0 %v1033_v3  ;;  %v143_v9 = vsel %vm141_vm0, %v897_v6, 0  ;;  %v1039_v10 = vld [vmem:[%s1348_s1 + $0xc] ss:$24 sps:$4 sm:$0xff]   ;;  %v1041_v11 = vld [vmem:[%s1348_s1 + $0x8] ss:$24 sps:$4 sm:$0xff]   ;;  %v50_v14 = vpack.c.bf16 %v49_v7, %v49_v7  ;;  %v900_v15 = vcombine.high %v58_v13, %v58_v13  ;;  %v899_v16 = vcombine.low %v58_v13, %v58_v13 }
  0x19   :  { %903 = vmatprep.subr.msk.bf16.mxu0 %vm141_vm0, %v898_v5  ;;  %v59_v12 = vld [vmem:[%s1348_s1 + $0x40] sm:$0xff]  ;;  %201 = vmatprep.subr.bf16.mxu1 %v1039_v10  ;;  %v1057_v28 = vld [vmem:[#allocation3 + $0x4c] ss:$12 sps:$4 sm:$0xff]   ;;  %v1055_v29 = vld [vmem:[#allocation3 + $0x48] ss:$12 sps:$4 sm:$0xff]   ;;  %v62_v6 = vlaneseq  ;;  %vm884_vm4 = vcmask 7168  }
  0x1a   :  { %202 = vmatpush1.bf16.msra.mxu1 %v1041_v11  ;;  %v902_v18 = vcombine.high %v59_v12, %v59_v12  ;;  %v901_v19 = vcombine.low %v59_v12, %v59_v12  ;;  %v149_v20 = vsel %vm141_vm0, %v899_v16, 0  ;;  %v1048_v21 = vld [vmem:[#allocation3 + $0x4] ss:$12 sps:$4 sm:$0xff]   ;;  %v1046_v22 = vld [vmem:[#allocation3] ss:$12 sps:$4 sm:$0xff]  }
  0x1b   :  { %905 = vmatprep.subr.msk.bf16.mxu1 %vm141_vm0, %v900_v15  ;;  %v1051_v23 = vld [vmem:[#allocation3 + $0x1c] ss:$12 sps:$4 sm:$0xff]   ;;  %v1049_v25 = vld [vmem:[#allocation3 + $0x18] ss:$12 sps:$4 sm:$0xff]   ;;  %v1054_v26 = vld [vmem:[#allocation3 + $0x34] ss:$12 sps:$4 sm:$0xff]  }
  0x1c   :  { %163 = vmatpush1.bf16.msra.mxu0 %v143_v9  ;;  %v155_v24 = vsel %vm141_vm0, %v901_v19, 0  ;;  %v1052_v27 = vld [vmem:[#allocation3 + $0x30] ss:$12 sps:$4 sm:$0xff]   ;;  %v1058_v31 = vld [vmem:[#allocation3 + $0x60] ss:$12 sps:$4 sm:$0xff]   ;;  %v1288_v7 = vshrl.u32 %v62_v6, 7 }
  0x1d   :  { %242 = vmatprep.subr.bf16.mxu0 %v1038_v8  ;;  %v1060_v30 = vld [vmem:[#allocation3 + $0x64] ss:$12 sps:$4 sm:$0xff]   ;;  %v1063_v32 = vld [vmem:[#allocation3 + $0x7c] ss:$12 sps:$4 sm:$0xff]   ;;  %v1066_v34 = vld [vmem:[#allocation3 + $0x94] ss:$12 sps:$4 sm:$0xff]  }
  0x1e   :  { %204 = vmatpush1.bf16.msra.mxu1 %v149_v20  ;;  %v1061_v33 = vld [vmem:[#allocation3 + $0x78] ss:$12 sps:$4 sm:$0xff]   ;;  %v1064_v35 = vld [vmem:[#allocation3 + $0x90] ss:$12 sps:$4 sm:$0xff]   ;;  %v1067_v37 = vld [vmem:[#allocation3 + $0xa8] ss:$12 sps:$4 sm:$0xff]  }
  0x1f   :  { %904 = vmatmul.mubr.msk.bf16.vlgmr.msra.gmra.mrb[0].mxu0 %vm137_vm1, %v50_v14  ;;  %654 = vmatprep.subr.bf16.mxu1 %v1048_v21  ;;  %v1069_v36 = vld [vmem:[#allocation3 + $0xac] ss:$12 sps:$4 sm:$0xff]   ;;  %v1072_v38 = vld [vmem:[#allocation3 + $0xc4] ss:$12 sps:$4 sm:$0xff]   ;;  %v1073_v39 = vld [vmem:[#allocation3 + $0xc8] ss:$12 sps:$4 sm:$0xff]  }
  0x20   :  { %243 = vmatpush1.bf16.msra.mxu0 %v1036_v17  ;;  %274 = vmatprep.mubr.bf16.mxu0 %v1181_v1  ;;  %v1070_v40 = vld [vmem:[#allocation3 + $0xc0] ss:$12 sps:$4 sm:$0xff]   ;;  %v1074_v41 = vld [vmem:[#allocation3 + $0x8] ss:$12 sps:$4 sm:$0xff]   ;;  %v1075_v44 = vld [vmem:[#allocation3 + $0xd8] ss:$12 sps:$4 sm:$0xff]  }
  0x21   :  { %907 = vmatprep.subr.msk.bf16.mxu0 %vm141_vm0, %v902_v18  ;;  %906 = vmatmul.mubr.msk.bf16.vlgmr.msra.gmra.mrb[0].mxu1 %vm137_vm1, %v50_v14  ;;  %v1077_v42 = vld [vmem:[#allocation3 + $0xdc] ss:$12 sps:$4 sm:$0xff]   ;;  %v1078_v43 = vld [vmem:[#allocation3 + $0xe0] ss:$12 sps:$4 sm:$0xff]   ;;  %v1083_v47 = vld [vmem:[#allocation3 + $0xf8] ss:$12 sps:$4 sm:$0xff]  }
  0x22   :  { %655 = vmatpush1.bf16.msra.mxu1 %v1046_v22  ;;  %v1079_v45 = vld [vmem:[#allocation3 + $0x20] ss:$12 sps:$4 sm:$0xff]   ;;  %v1080_v48 = vld [vmem:[#allocation3 + $0xf0] ss:$12 sps:$4 sm:$0xff]   ;;  %v1084_v49 = vld [vmem:[#allocation3 + $0x38] ss:$12 sps:$4 sm:$0xff]  }
  0x23   :  { %656 = vmatprep.subr.bf16.mxu1 %v1051_v23  ;;  %v1082_v46 = vld [vmem:[#allocation3 + $0xf4] ss:$12 sps:$4 sm:$0xff]   ;;  %v1087_v50 = vld [vmem:[#allocation3 + $0x10c] ss:$12 sps:$4 sm:$0xff]   ;;  %v1088_v51 = vld [vmem:[#allocation3 + $0x110] ss:$12 sps:$4 sm:$0xff]  }
  0x24   :  { %245 = vmatpush1.bf16.msra.mxu0 %v155_v24  ;;  %v1085_v52 = vld [vmem:[#allocation3 + $0x108] ss:$12 sps:$4 sm:$0xff]   ;;  %v1089_v53 = vld [vmem:[#allocation3 + $0x50] ss:$12 sps:$4 sm:$0xff]   ;;  %v1090_v56 = vld [vmem:[#allocation3 + $0x120] ss:$12 sps:$4 sm:$0xff]  }
  0x25   :  { %974 = vmatprep.subr.bf16.mxu0 %v1073_v39  ;;  %v1092_v54 = vld [vmem:[#allocation3 + $0x124] ss:$12 sps:$4 sm:$0xff]   ;;  %v1093_v55 = vld [vmem:[#allocation3 + $0x128] ss:$12 sps:$4 sm:$0xff]   ;;  %v1098_v59 = vld [vmem:[#allocation3 + $0x140] ss:$12 sps:$4 sm:$0xff]  }
  0x26   :  { %657 = vmatpush1.bf16.msra.mxu1 %v1049_v25  ;;  %v1094_v57 = vld [vmem:[#allocation3 + $0x68] ss:$12 sps:$4 sm:$0xff]   ;;  %v1095_v60 = vld [vmem:[#allocation3 + $0x138] ss:$12 sps:$4 sm:$0xff]   ;;  %v1099_v61 = vld [vmem:[#allocation3 + $0x80] ss:$12 sps:$4 sm:$0xff]  }
  0x27   :  { %908 = vmatmul.mubr.msk.bf16.vlgmr.msra.gmra.mrb[4].mxu0 %vm137_vm1, %v50_v14  ;;  %658 = vmatprep.subr.bf16.mxu1 %v1054_v26  ;;  %v1097_v58 = vld [vmem:[#allocation3 + $0x13c] ss:$12 sps:$4 sm:$0xff]   ;;  %v1102_v62 = vld [vmem:[#allocation3 + $0x154] ss:$12 sps:$4 sm:$0xff]   ;;  %v1103_v63 = vld [vmem:[#allocation3 + $0x158] ss:$12 sps:$4 sm:$0xff]  }
  0x28   :  { %975 = vmatpush3.bf16.msra.mxu0 %v1074_v41  ;;  %v1100_v0 = vld [vmem:[#allocation3 + $0x150] ss:$12 sps:$4 sm:$0xff]   ;;  %v1104_v1 = vld [vmem:[#allocation3 + $0x98] ss:$12 sps:$4 sm:$0xff]   ;;  %v1105_v4 = vld [vmem:[#allocation3 + $0x168] ss:$12 sps:$4 sm:$0xff]  }
  0x29   :  { %976 = vmatprep.subr.bf16.mxu0 %v1078_v43  ;;  %v1107_v2 = vld [vmem:[#allocation3 + $0x16c] ss:$12 sps:$4 sm:$0xff]   ;;  %v1108_v3 = vld [vmem:[#allocation3 + $0x170] ss:$12 sps:$4 sm:$0xff]   ;;  %v64_v8 = vsub.s32 0, %v1288_v7  ;;  %v68_v10 = vsub.s32 1, %v1288_v7 }
  0x2a   :  { %659 = vmatpush1.bf16.msra.mxu1 %v1052_v27  ;;  %v1109_v5 = vld [vmem:[#allocation3 + $0xb0] ss:$12 sps:$4 sm:$0xff]   ;;  %v80_v16 = vsub.s32 4, %v1288_v7  ;;  %v84_v19 = vsub.s32 5, %v1288_v7  ;;  %v72_v23 = vsub.s32 2, %v1288_v7  ;;  %v76_v26 = vsub.s32 3, %v1288_v7 }
  0x2b   :  { %660 = vmatprep.subr.bf16.mxu1 %v1057_v28  ;;  %v60_v9 = vld [vmem:[%s1349_s2] sm:$0x3f] }
  0x2c   :  { %977 = vmatpush3.bf16.msra.mxu0 %v1079_v45  ;;  %v65_v11 = vrot.slane %v60_v9, %v64_v8  ;;  %v69_v12 = vrot.slane %v60_v9, %v68_v10  ;;  %v81_v25 = vrot.slane %v60_v9, %v80_v16  ;;  %v85_v28 = vrot.slane %v60_v9, %v84_v19  ;;  %v1114_v6 = vld [vmem:[%s1352_s5 + $0x20] sm:$0xff]  }
  0x2d   :  { %978 = vmatprep.subr.bf16.mxu0 %v1083_v47  ;;  %v963_v7 = vld [vmem:[%s1353_s6] ss:$0 sm:$0xff] }
  0x2e   :  { %661 = vmatpush1.bf16.msra.mxu1 %v1055_v29 }
  0x2f   :  { %662 = vmatprep.subr.bf16.mxu1 %v1060_v30 }
  0x30   :  { %979 = vmatpush3.bf16.msra.mxu0 %v1084_v49 }
  0x31   :  { %980 = vmatprep.subr.bf16.mxu0 %v1088_v51 }
  0x32   :  { %663 = vmatpush1.bf16.msra.mxu1 %v1058_v31 }
  0x33   :  { %664 = vmatprep.subr.bf16.mxu1 %v1063_v32  ;;  %v73_v32 = vrot.slane %v60_v9, %v72_v23 }
  0x34   :  { %981 = vmatpush3.bf16.msra.mxu0 %v1089_v53 }
  0x35   :  { %982 = vmatprep.subr.bf16.mxu0 %v1093_v55 }
  0x36   :  { %665 = vmatpush1.bf16.msra.mxu1 %v1061_v33 }
  0x37   :  { %666 = vmatprep.subr.bf16.mxu1 %v1066_v34 }
  0x38   :  { %983 = vmatpush3.bf16.msra.mxu0 %v1094_v57 }
  0x39   :  { %984 = vmatprep.subr.bf16.mxu0 %v1098_v59 }
  0x3a   :  { %667 = vmatpush1.bf16.msra.mxu1 %v1064_v35  ;;  %v77_v35 = vrot.slane %v60_v9, %v76_v26  ;;  %v1115_v9 = vld [vmem:[%s1352_s5 + $0x28] sm:$0xff]  }
  0x3b   :  { %668 = vmatprep.subr.bf16.mxu1 %v1069_v36 }
  0x3c   :  { %985 = vmatpush3.bf16.msra.mxu0 %v1099_v61 }
  0x3d   :  { %986 = vmatprep.subr.bf16.mxu0 %v1103_v63 }
  0x3e   :  { %669 = vmatpush1.bf16.msra.mxu1 %v1067_v37 }
  0x3f   :  { %670 = vmatprep.subr.bf16.mxu1 %v1072_v38 }
  0x40   :  { %987 = vmatpush3.bf16.msra.mxu0 %v1104_v1  ;;  %v1110_v1 = vld [vmem:[%s1352_s5] sm:$0xff]  }
  0x41   :  { %988 = vmatprep.subr.bf16.mxu0 %v1108_v3  ;;  %v1111_v3 = vld [vmem:[%s1352_s5 + $0x8] sm:$0xff]  }
  0x42   :  { %671 = vmatpush1.bf16.msra.mxu1 %v1070_v40 }
  0x43   :  { %672 = vmatprep.subr.bf16.mxu1 %v1077_v42 }
  0x44   :  { %989 = vmatpush3.bf16.msra.mxu0 %v1109_v5  ;;  %v1113_v5 = vld [vmem:[%s1352_s5 + $0x18] sm:$0xff]  }
  0x46   :  { %673 = vmatpush1.bf16.msra.mxu1 %v1075_v44 }
  0x47   :  { %674 = vmatprep.subr.bf16.mxu1 %v1082_v46 }
  0x4a   :  { %675 = vmatpush1.bf16.msra.mxu1 %v1080_v48 }
  0x4b   :  { %676 = vmatprep.subr.bf16.mxu1 %v1087_v50 }
  0x4e   :  { %677 = vmatpush1.bf16.msra.mxu1 %v1085_v52 }
  0x4f   :  { %678 = vmatprep.subr.bf16.mxu1 %v1092_v54 }
  0x52   :  { %679 = vmatpush1.bf16.msra.mxu1 %v1090_v56 }
  0x53   :  { %680 = vmatprep.subr.bf16.mxu1 %v1097_v58 }
  0x56   :  { %681 = vmatpush1.bf16.msra.mxu1 %v1095_v60 }
  0x57   :  { %682 = vmatprep.subr.bf16.mxu1 %v1102_v62 }
  0x5a   :  { %683 = vmatpush1.bf16.msra.mxu1 %v1100_v0 }
  0x5b   :  { %684 = vmatprep.subr.bf16.mxu1 %v1107_v2  ;;  %v1182_v2 = vmov 0.0  }
  0x5c   :  { %1005 = vmatprep.subr.bf16.mxu0 %v1182_v2 }
  0x5e   :  { %685 = vmatpush1.bf16.msra.mxu1 %v1105_v4  ;;  %v1112_v4 = vld [vmem:[%s1352_s5 + $0x10] sm:$0xff]  }
  0xf2   :  { %v194_v13 = vpop.f32.mrb[0].mxu0 }
  0xf3   :  { %v195_v14 = vadd.f32 %v194_v13, %v65_v11  ;;  %v196_v15 = vpop.f32.mrb[1].mxu0  ;;  %v1116_v11 = vld [vmem:[%s1352_s5 + $0x30] sm:$0xff]   ;;  %v381_v13 = vld [vmem:[%s1351_s4] sm:$0x7] }
  0xf4   :  { %v197_v17 = vadd.f32 %v196_v15, %v69_v12  ;;  %v198_v18 = vpop.f32.mrb[2].mxu0  ;;  %v235_v24 = vpop.f32.mrb[0].mxu1  ;;  %v1117_v12 = vld [vmem:[%s1352_s5 + $0x38] sm:$0xff]   ;;  %v394_v19 = vrot.slane %v381_v13, %v72_v23 }
  0xf5   :  { %v909_v20 = vmul.f32 -1.442695, %v195_v14  ;;  %v199_v21 = vpop.f32.mrb[3].mxu0  ;;  %v237_v27 = vpop.f32.mrb[1].mxu1  ;;  %v236_v41 = vadd.f32 %v235_v24, %v73_v32  ;;  %v386_v14 = vrot.slane %v381_v13, %v64_v8 }
  0xf6   :  { %v910_v22 = vmul.f32 -1.442695, %v197_v17  ;;  %v239_v29 = vpop.f32.mrb[2].mxu1  ;;  %v238_v42 = vadd.f32 %v237_v27, %v77_v35 }
  0xf7   :  { %1118 = vpow2.f32 %v909_v20  ;;  %v240_v30 = vpop.f32.mrb[3].mxu1  ;;  %v390_v29 = vrot.slane %v381_v13, %v68_v10 }
  0xf8   :  { %1120 = vpow2.f32 %v910_v22 }
  0xfa   :  { %v276_v31 = vpop.f32.mrb[4].mxu0 }
  0xfb   :  { %v277_v33 = vadd.f32 %v276_v31, %v81_v25  ;;  %v278_v34 = vpop.f32.mrb[5].mxu0 }
  0xfc   :  { %v279_v36 = vadd.f32 %v278_v34, %v85_v28  ;;  %v280_v37 = vpop.f32.mrb[6].mxu0 }
  0xfd   :  { %v911_v38 = vmul.f32 -1.442695, %v277_v33  ;;  %v281_v39 = vpop.f32.mrb[7].mxu0 }
  0xfe   :  { %v912_v40 = vmul.f32 -1.442695, %v279_v36 }
  0xff   :  { %1122 = vpow2.f32 %v911_v38 }
 0x100   :  { %1124 = vpow2.f32 %v912_v40 }
 0x101   :  { %v1119_v43 = vpop.eup %1118  ;;  %1126 = vtanh.f32 %v236_v41 }
 0x102   :  { %v1121_v44 = vpop.eup %1120  ;;  %v289_v45 = vadd.f32 1.0, %v1119_v43  ;;  %1128 = vtanh.f32 %v238_v42 }
 0x103   :  { %v290_v46 = vadd.f32 1.0, %v1121_v44  ;;  %v972_v44 = vld [vmem:[%s1354_s7] ss:$0 sm:$0xff] }
 0x104   :  { %1130 = vrcp.f32 %v289_v45 }
 0x105   :  { %1132 = vrcp.f32 %v290_v46 }
 0x109   :  { %v1123_v47 = vpop.eup %1122 }
 0x10a   :  { %v1125_v48 = vpop.eup %1124  ;;  %v305_v49 = vadd.f32 1.0, %v1123_v47 }
 0x10b   :  { %v1127_v50 = vpop.eup %1126  ;;  %v306_v51 = vadd.f32 1.0, %v1125_v48 }
 0x10c   :  { %v1129_v52 = vpop.eup %1128  ;;  %1134 = vrcp.f32 %v305_v49  ;;  %v973_v49 = vld [vmem:[#allocation2] ss:$0 sm:$0xff] }
 0x10d   :  { %1136 = vrcp.f32 %v306_v51 }
 0x10e   :  { %v1131_v53 = vpop.eup %1130 }
 0x10f   :  { %v1133_v54 = vpop.eup %1132  ;;  %v297_v55 = vmul.f32 %v1131_v53, %v1127_v50 }
 0x110   :  { %v298_v56 = vmul.f32 %v1133_v54, %v1129_v52 }
 0x111   :  { %1138 = vtanh.f32 %v297_v55 }
 0x112   :  { %1140 = vtanh.f32 %v298_v56 }
 0x116   :  { %v1135_v57 = vpop.eup %1134 }
 0x117   :  { %v1137_v58 = vpop.eup %1136 }
 0x11b   :  { %v1139_v59 = vpop.eup %1138 }
 0x11c   :  { %v1141_v60 = vpop.eup %1140  ;;  %v313_v61 = vmul.f32 %v1139_v59, %v1135_v57 }
 0x11d   :  { %v314_v62 = vmul.f32 %v1141_v60, %v1137_v58 }
 0x11e   :  { %v315_v0 = vpack.c.bf16 %v313_v61, %v313_v61 }
 0x11f   :  { %v316_v63 = vpack.c.bf16 %v314_v62, %v314_v62 }
 0x121   :  { %686 = vmatprep.mubr.bf16.mxu1 %v316_v63  ;;  %727 = vmatprep.mubr.bf16.mxu0 %v316_v63 }
 0x122   :  { %687 = vmatmul.mubr.bf16.vlgmr.msra.gmra.mrb[4].mxu1 %v315_v0  ;;  %728 = vmatmul.mubr.bf16.vlgmr.msra.gmra.mrb[8].mxu0 %v315_v0 }
 0x123   :  { %1006 = vmatpush3.bf16.msra.mxu0 %v1110_v1  ;;  %1021 = vmatprep.mubr.msk.bf16.mxu0 %vm1183_vm2, %v1182_v2 }
 0x124   :  { %1007 = vmatprep.subr.bf16.mxu0 %v1182_v2 }
 0x127   :  { %1008 = vmatpush3.bf16.msra.mxu0 %v1111_v3 }
 0x128   :  { %1009 = vmatprep.subr.bf16.mxu0 %v1182_v2 }
 0x12b   :  { %1010 = vmatpush3.bf16.msra.mxu0 %v1112_v4 }
 0x12c   :  { %1011 = vmatprep.subr.bf16.mxu0 %v1182_v2 }
 0x12f   :  { %1012 = vmatpush3.bf16.msra.mxu0 %v1113_v5 }
 0x130   :  { %1013 = vmatprep.subr.bf16.mxu0 %v1182_v2 }
 0x133   :  { %1014 = vmatpush3.bf16.msra.mxu0 %v1114_v6 }
 0x134   :  { %1015 = vmatprep.subr.bf16.mxu0 %v1182_v2 }
 0x137   :  { %1016 = vmatpush3.bf16.msra.mxu0 %v1115_v9 }
 0x138   :  { %1017 = vmatprep.subr.bf16.mxu0 %v1182_v2 }
 0x13b   :  { %1018 = vmatpush3.bf16.msra.mxu0 %v1116_v11 }
 0x13c   :  { %1019 = vmatprep.subr.bf16.mxu0 %v1182_v2 }
 0x13f   :  { %1020 = vmatpush3.bf16.msra.mxu0 %v1117_v12 }
 0x1f5   :  { %v688_v15 = vpop.f32.mrb[4].mxu1  ;;  %v990_v16 = vpop.f32.mrb[8].mxu0 }
 0x1f6   :  { %v689_v17 = vadd.f32 %v688_v15, %v386_v14  ;;  %v690_v18 = vpop.f32.mrb[5].mxu1  ;;  %v991_v20 = vpop.f32.mrb[9].mxu0 }
 0x1f7   :  { %v992_v21 = vadd.f32 %v991_v20, %v990_v16  ;;  %v692_v22 = vpop.f32.mrb[6].mxu1  ;;  %v993_v24 = vpop.f32.mrb[10].mxu0  ;;  %v691_v30 = vadd.f32 %v690_v18, %v390_v29 }
 0x1f8   :  { %v961_v25 = vmul.f32 -1.442695, %v689_v17  ;;  %v693_v26 = vpop.f32.mrb[7].mxu1  ;;  %v994_v27 = vpop.f32.mrb[11].mxu0 }
 0x1f9   :  { %v730_v28 = vadd.f32 %v992_v21, %v394_v19 }
 0x1fa   :  { %1142 = vpow2.f32 %v961_v25 }
 0x1fb   :  { %v962_v8 = vmul.f32 -1.442695, %v730_v28 }
 0x1fd   :  { %1144 = vpow2.f32 %v962_v8 }
 0x1fe   :  { %1146 = vtanh.f32 %v691_v30 }
 0x204   :  { %v1143_v31 = vpop.eup %1142 }
 0x205   :  { %v738_v32 = vadd.f32 1.0, %v1143_v31 }
 0x207   :  { %1148 = vrcp.f32 %v738_v32  ;;  %v1145_v23 = vpop.eup %1144 }
 0x208   :  { %v746_v33 = vadd.f32 1.0, %v1145_v23  ;;  %v1147_v34 = vpop.eup %1146 }
 0x20a   :  { %1150 = vrcp.f32 %v746_v33 }
 0x211   :  { %v1149_v35 = vpop.eup %1148 }
 0x212   :  { %v742_v36 = vmul.f32 %v1149_v35, %v1147_v34 }
 0x214   :  { %1152 = vtanh.f32 %v742_v36  ;;  %v1151_v37 = vpop.eup %1150 }
 0x21e   :  { %v1153_v38 = vpop.eup %1152 }
 0x21f   :  { %v750_v39 = vmul.f32 %v1153_v38, %v1151_v37 }
 0x221   :  { %v751_v40 = vpack.c.bf16 %v750_v39, %v750_v39 }
 0x223   :  { %1022 = vmatmul.mubr.bf16.vlgmr.msra.gmra.mrb[12].mxu0 %v751_v40 }
 0x2f6   :  { %v857_v10 = vpop.f32.mrb[12].mxu0 }
 0x2f7   :  { %v858_v41 = vadd.f32 %v963_v7, %v857_v10  ;;  %v1023_v42 = vpop.f32.mrb[13].mxu0 }
 0x2f8   :  { %v860_v43 = vpop.f32.mrb[14].mxu0 }
 0x2f9   :  { %v863_v45 = vmax.f32 %v858_v41, 0.0  ;;  %v1024_v46 = vpop.f32.mrb[15].mxu0 }
 0x2fb   :  { %v871_v47 = vmul.f32 %v972_v44, %v863_v45 }
 0x2fd   :  { %v873_v48 = vsel %vm872_vm3, %v871_v47, 0.0 }
 0x2fe   :  { %874 = vadd.xlane.f32.xlu0 %v873_v48 }
 0x38b   :  { %v875_v50 = vpop.xlane.xlu0 %874 }
 0x38c   :  { %v883_v51 = vadd.f32 %v973_v49, %v875_v50 }
 0x38e   :  { %885 = vst.msk [vmem:[%s1356_s9] sm:$0xff] %vm884_vm4, %v883_v51 }
 0x38f   :  { %890 = vsyncpa [#allocation4], 1 }

</bundles_post_ra>
